<compile_context>
chip_gen: v7x
topology: tpu7x:2x2x1
jax: 0.10.0
libtpu: 0.0.40
codegen_flags: <defaults>
</compile_context>

<pallas_src>
import functools

import jax
import jax.numpy as jnp
from jax import lax
from jax.experimental import pallas as pl
from jax.experimental.pallas import tpu as pltpu


def _patch_nce_kernel(q_ref, kpos_ref, k_ref, loss_ref,
                      qs_ref, m_ref, se_ref, pos_ref, *,
                      inv_T, neg_fill, op_dtype, fold_scale, lanes, tile_k,
                      valid_b):
    """Grid step (i, j): TB query rows vs. the j-th tile of TK key rows."""
    j = pl.program_id(1)
    nk = pl.num_programs(1)

    @pl.when(j == 0)
    def _init():
        qf = q_ref[...].astype(jnp.float32)
        kf = kpos_ref[...].astype(jnp.float32)
        # Positive logit l_pos/T from the row-aligned key tile (once per row tile).
        pos_ref[...] = jnp.sum(qf * kf, axis=-1, keepdims=True) * inv_T
        if fold_scale:
            # Fold 1/T into the q operand (exact in the f32 path).
            qs_ref[...] = (qf * inv_T).astype(op_dtype)
        else:
            qs_ref[...] = q_ref[...].astype(op_dtype)
        m_ref[...] = jnp.full_like(m_ref, -1e30)
        se_ref[...] = jnp.zeros_like(se_ref)

    # Negative logits for this key tile ("NT" contraction -> no transpose;
    # D stays on the lane axis for both operands).
    s = lax.dot_general(
        qs_ref[...], k_ref[...].astype(op_dtype),
        dimension_numbers=(((1,), (1,)), ((), ())),
        preferred_element_type=jnp.float32)
    if not fold_scale:
        s = s * inv_T

    if valid_b is not None:
        # B was padded: knock out the padded key columns so they add nothing.
        col = j * tile_k + lax.broadcasted_iota(jnp.int32, s.shape, 1)
        s = jnp.where(col < valid_b, s, -1e30)

    # Lane-wise online logsumexp update (pure VPU/EUP; no per-step XLU reduce).
    n_chunks = tile_k // lanes
    m_prev = m_ref[...]
    step_max = s[:, 0:lanes]
    for h in range(1, n_chunks):
        step_max = jnp.maximum(step_max, s[:, h * lanes:(h + 1) * lanes])
    m_new = jnp.maximum(m_prev, step_max)
    acc = se_ref[...] * jnp.exp(m_prev - m_new)
    for h in range(n_chunks):
        acc = acc + jnp.exp(s[:, h * lanes:(h + 1) * lanes] - m_new)
    se_ref[...] = acc
    m_ref[...] = m_new

    @pl.when(j == nk - 1)
    def _finalize():
        m = m_ref[...]
        m_row = jnp.max(m, axis=-1, keepdims=True)                    # (tb, 1)
        se_row = jnp.sum(se_ref[...] * jnp.exp(m - m_row),
                         axis=-1, keepdims=True)
        # The streamed raw diagonal s[r,r]/T already plays the role of the
        # l_pos column of `out`; only the module's -10.0 diagonal fill is
        # still missing from the logsumexp.
        se_row = se_row + jnp.exp(neg_fill * inv_T - m_row)
        loss_ref[...] = m_row + jnp.log(se_row) - pos_ref[...]        # (tb, 1)


def _round_up(x, m):
    return ((x + m - 1) // m) * m


def _vmem_capacity_bytes():
    try:
        return int(pltpu.get_tpu_info().vmem_capacity_bytes)
    except Exception:
        return 64 * 1024 * 1024  # conservative (v7x per-TC VMEM)


def _pick_tile(n, preferred):
    """Largest divisor of n <= preferred, preferring multiples of 256/128/8."""
    cap = max(1, min(preferred, n))
    for align in (256, 128, 8):
        if cap < align:
            continue
        t = cap - (cap % align)
        while t >= align:
            if n % t == 0:
                return t
            t -= align
    for t in range(cap, 0, -1):
        if n % t == 0:
            return t
    return n


def _vmem_bytes(tb, tk, D, in_bytes, op_bytes, kbuf):
    b = 0
    b += 2 * tb * D * in_bytes        # q block (double buffered)
    b += 2 * tb * D * in_bytes        # row-aligned key block (l_pos)
    b += kbuf * tk * D * in_bytes     # streamed key block (multi-buffered)
    b += tb * D * op_bytes            # scaled-q scratch
    b += 2 * tb * 128 * 4             # lane-wise m / se scratch
    b += 3 * tb * 4                   # out_pos scratch + output block
    b += 3 * tb * tk * 4              # s / exp(s) f32 intermediates
    return b


def _choose_tiles(B, D, in_bytes, op_bytes, budget):
    # Keep >= 2 row tiles when B allows it so the parallel axis can split
    # across TensorCores (v7x megacore); tb capped at 512.
    tb_cap = min(512, B // 2) if B >= 64 else B
    tb = _pick_tile(B, tb_cap)
    tk = _pick_tile(B, 2048)
    for _ in range(64):
        if _vmem_bytes(tb, tk, D, in_bytes, op_bytes, 3) <= budget:
            break
        if tk >= tb and tk > 128:
            tk = _pick_tile(B, max(128, tk // 2))
        elif tb > 8:
            tb = _pick_tile(B, max(8, tb // 2))
        elif tk > 128:
            tk = _pick_tile(B, max(128, tk // 2))
        else:
            break
    return tb, tk


def patch_nce_loss(feat_q, feat_k, T=0.07, tile_b=None, tile_k=None,
                   compute_dtype=None):
    """Pallas implementation of PatchNCELoss.forward (weight=None)."""
    # TODO(synk): optional `weight` multiplier on l_neg is not implemented
    # (the module is normally called with weight=None).
    B, D = feat_q.shape
    assert feat_k.shape == (B, D)
    assert feat_q.dtype == feat_k.dtype
    in_dtype = jnp.dtype(feat_q.dtype)
    op_dtype = jnp.dtype(compute_dtype) if compute_dtype is not None else in_dtype

    # Pad the batch/patch axis so tiles stay (8,128)-friendly; padded key
    # columns are masked to a large negative inside the kernel, padded rows
    # are sliced off after the call.
    pad_mult = 8 if B <= 128 else 128
    B_pad = _round_up(B, pad_mult)
    padded = B_pad != B
    if padded:
        feat_q = jnp.pad(feat_q, ((0, B_pad - B), (0, 0)))
        feat_k = jnp.pad(feat_k, ((0, B_pad - B), (0, 0)))

    vmem_cap = _vmem_capacity_bytes()
    vmem_limit = (vmem_cap * 3) // 4          # scoped-VMEM ceiling we request
    tile_budget = int(vmem_limit * 0.85)      # headroom for compiler scratch

    auto_tb, auto_tk = _choose_tiles(B_pad, D, in_dtype.itemsize,
                                     op_dtype.itemsize, tile_budget)
    tb = tile_b if tile_b is not None else auto_tb
    tk = tile_k if tile_k is not None else auto_tk
    assert B_pad % tb == 0 and B_pad % tk == 0, (B_pad, tb, tk)
    assert tb % 8 == 0 or tb == B_pad
    assert tk % 8 == 0 or tk == B_pad

    lanes = 128 if tk % 128 == 0 else tk
    fold_scale = (op_dtype == jnp.dtype(jnp.float32))

    kernel = functools.partial(
        _patch_nce_kernel,
        inv_T=float(1.0 / T), neg_fill=-10.0,
        op_dtype=op_dtype, fold_scale=fold_scale,
        lanes=lanes, tile_k=tk, valid_b=(B if padded else None))

    k_index_map = lambda i, j: (j, 0)
    if B_pad // tk >= 3:
        try:   # triple-buffer the streamed key tiles to hide DMA jitter
            k_spec = pl.BlockSpec((tk, D), k_index_map,
                                  pipeline_mode=pl.Buffered(3))
        except Exception:  # BlockSpec without pipeline_mode support
            k_spec = pl.BlockSpec((tk, D), k_index_map)
    else:
        k_spec = pl.BlockSpec((tk, D), k_index_map)

    out = pl.pallas_call(
        kernel,
        out_shape=jax.ShapeDtypeStruct((B_pad, 1), jnp.float32),
        grid_spec=pltpu.PrefetchScalarGridSpec(
            num_scalar_prefetch=0,
            grid=(B_pad // tb, B_pad // tk),
            in_specs=[
                pl.BlockSpec((tb, D), lambda i, j: (i, 0)),  # query row tile
                pl.BlockSpec((tb, D), lambda i, j: (i, 0)),  # aligned key rows (l_pos)
                k_spec,                                      # streamed key tiles
            ],
            out_specs=pl.BlockSpec((tb, 1), lambda i, j: (i, 0)),
            scratch_shapes=[
                pltpu.VMEM((tb, D), op_dtype),         # 1/T-scaled q operand
                pltpu.VMEM((tb, lanes), jnp.float32),  # lane-wise running max
                pltpu.VMEM((tb, lanes), jnp.float32),  # lane-wise running sumexp
                pltpu.VMEM((tb, 1), jnp.float32),      # out_pos = l_pos / T
            ],
        ),
        compiler_params=pltpu.CompilerParams(
            dimension_semantics=("parallel", "arbitrary"),
            vmem_limit_bytes=int(vmem_limit)),
    )(feat_q, feat_k, feat_k)
    return out[:B, 0]


def _reference(feat_q, feat_k, T=0.07):
    """Pure-JAX reference mirroring the PyTorch forward (weight=None)."""
    B = feat_q.shape[0]
    s = feat_q @ feat_k.T
    l_pos = jnp.diag(s)[:, None]
    l_neg = jnp.where(jnp.eye(B, dtype=bool), -10.0, s)
    out = jnp.concatenate([l_pos, l_neg], axis=1) / T
    return jax.nn.logsumexp(out, axis=1) - out[:, 0]


if __name__ == "__main__":
    T = 0.07
    key = jax.random.PRNGKey(0)

    def make_feats(k, B, D, dtype):
        kq, kk = jax.random.split(k)
        fq = jax.random.normal(kq, (B, D), dtype=jnp.float32)
        fk = jax.random.normal(kk, (B, D), dtype=jnp.float32)
        fq = fq / jnp.linalg.norm(fq, axis=1, keepdims=True)
        fk = fk / jnp.linalg.norm(fk, axis=1, keepdims=True)
        return fq.astype(dtype), fk.astype(dtype)

    cases = [
        # (B, D, tile_b, tile_k, dtype, atol, rtol)
        (8,   32, None, None, jnp.float32, 1e-4, 1e-3),    # single tile
        (16,  32, 8,    8,    jnp.float32, 1e-4, 1e-3),    # multi row/key tiles (lanes<128)
        (20,  32, None, None, jnp.float32, 1e-4, 1e-3),    # padded B, masked tail columns
        (512, 32, 128,  256,  jnp.float32, 1e-4, 1e-3),    # multi-chunk lane accumulators
        (512, 32, 128,  128,  jnp.float32, 1e-4, 1e-3),    # deep key stream (Buffered(3))
        (64,  32, None, None, jnp.bfloat16, 2e-3, 2e-3),   # native bf16 inputs -> bf16 MXU
    ]
    for (B, D, tb, tk, dtype, atol, rtol) in cases:
        key, sub = jax.random.split(key)
        fq, fk = make_feats(sub, B, D, dtype)
        loss = patch_nce_loss(fq, fk, T=T, tile_b=tb, tile_k=tk)
        loss = jax.block_until_ready(loss)
        ref = _reference(fq.astype(jnp.float32), fk.astype(jnp.float32), T=T)
        assert loss.shape == (B,)
        assert jnp.allclose(loss, ref, atol=atol, rtol=rtol), (B, D, str(dtype), loss, ref)

    print("KERNEL_OK")
</pallas_src>

<mosaic_0001>
module attributes {stable_mosaic.version = 11 : i64} {
  func.func @_patch_nce_kernel(%arg0: i32, %arg1: i32, %arg2: memref<8x32xf32, #tpu.memory_space<vmem>>, %arg3: memref<8x32xf32, #tpu.memory_space<vmem>>, %arg4: memref<8x32xf32, #tpu.memory_space<vmem>>, %arg5: memref<8x1xf32, #tpu.memory_space<vmem>>, %arg6: memref<8x32xf32, #tpu.memory_space<vmem>>, %arg7: memref<8x8xf32, #tpu.memory_space<vmem>>, %arg8: memref<8x8xf32, #tpu.memory_space<vmem>>, %arg9: memref<8x1xf32, #tpu.memory_space<vmem>>) attributes {dimension_semantics = [#tpu.dimension_semantics<parallel>, #tpu.dimension_semantics<arbitrary>], iteration_bounds = array<i64: 1, 1>, scalar_prefetch = 0 : i64, scratch_operands = 4 : i64, tpu.core_type = #tpu.core_type<tc>, window_params = [{transform_indices = @transform_0, window_bounds = array<i64: 8, 32>}, {transform_indices = @transform_1, window_bounds = array<i64: 8, 32>}, {transform_indices = @transform_2, window_bounds = array<i64: 8, 32>}, {transform_indices = @transform_3, window_bounds = array<i64: 8, 1>}]} {
    %c0_i32 = arith.constant 0 : i32
    %0 = arith.cmpi eq, %arg1, %c0_i32 : i32
    %1 = arith.extui %0 : i1 to i32
    %c0_i32_0 = arith.constant 0 : i32
    %2 = arith.cmpi ne, %1, %c0_i32_0 : i32
    scf.if %2 {
      %c0_14 = arith.constant 0 : index
      %c0_15 = arith.constant 0 : index
      %20 = vector.load %arg2[%c0_14, %c0_15] : memref<8x32xf32, #tpu.memory_space<vmem>>, vector<8x32xf32>
      %c0_16 = arith.constant 0 : index
      %c0_17 = arith.constant 0 : index
      %21 = vector.load %arg3[%c0_16, %c0_17] : memref<8x32xf32, #tpu.memory_space<vmem>>, vector<8x32xf32>
      %22 = arith.mulf %20, %21 : vector<8x32xf32>
      %cst_18 = arith.constant dense<0.000000e+00> : vector<8xf32>
      %23 = vector.multi_reduction <add>, %22, %cst_18 [1] : vector<8x32xf32> to vector<8xf32>
      %24 = vector.shape_cast %23 : vector<8xf32> to vector<8x1xf32>
      %cst_19 = arith.constant 14.2857141 : f32
      %25 = vector.broadcast %cst_19 : f32 to vector<8x1xf32>
      %26 = arith.mulf %24, %25 : vector<8x1xf32>
      %c0_20 = arith.constant 0 : index
      %c0_21 = arith.constant 0 : index
      %27 = vector.load %arg9[%c0_20, %c0_21] : memref<8x1xf32, #tpu.memory_space<vmem>>, vector<8x1xf32>
      tpu.vector_store %arg9[%c0_20, %c0_21], %26 {strides = array<i32>} : memref<8x1xf32, #tpu.memory_space<vmem>>, vector<8x1xf32>,
      %cst_22 = arith.constant 14.2857141 : f32
      %28 = vector.broadcast %cst_22 : f32 to vector<8x32xf32>
      %29 = arith.mulf %20, %28 : vector<8x32xf32>
      %c0_23 = arith.constant 0 : index
      %c0_24 = arith.constant 0 : index
      %30 = vector.load %arg6[%c0_23, %c0_24] : memref<8x32xf32, #tpu.memory_space<vmem>>, vector<8x32xf32>
      tpu.vector_store %arg6[%c0_23, %c0_24], %29 {strides = array<i32>} : memref<8x32xf32, #tpu.memory_space<vmem>>, vector<8x32xf32>,
      %cst_25 = arith.constant -1.000000e+30 : f32
      %31 = vector.broadcast %cst_25 : f32 to vector<8x8xf32>
      %c0_26 = arith.constant 0 : index
      %c0_27 = arith.constant 0 : index
      %32 = vector.load %arg7[%c0_26, %c0_27] : memref<8x8xf32, #tpu.memory_space<vmem>>, vector<8x8xf32>
      tpu.vector_store %arg7[%c0_26, %c0_27], %31 {strides = array<i32>} : memref<8x8xf32, #tpu.memory_space<vmem>>, vector<8x8xf32>,
      %cst_28 = arith.constant 0.000000e+00 : f32
      %33 = vector.broadcast %cst_28 : f32 to vector<8x8xf32>
      %c0_29 = arith.constant 0 : index
      %c0_30 = arith.constant 0 : index
      %34 = vector.load %arg8[%c0_29, %c0_30] : memref<8x8xf32, #tpu.memory_space<vmem>>, vector<8x8xf32>
      tpu.vector_store %arg8[%c0_29, %c0_30], %33 {strides = array<i32>} : memref<8x8xf32, #tpu.memory_space<vmem>>, vector<8x8xf32>,
    } else {
    }
    %c0 = arith.constant 0 : index
    %c0_1 = arith.constant 0 : index
    %3 = vector.load %arg6[%c0, %c0_1] : memref<8x32xf32, #tpu.memory_space<vmem>>, vector<8x32xf32>
    %c0_2 = arith.constant 0 : index
    %c0_3 = arith.constant 0 : index
    %4 = vector.load %arg4[%c0_2, %c0_3] : memref<8x32xf32, #tpu.memory_space<vmem>>, vector<8x32xf32>
    %cst = arith.constant dense<0.000000e+00> : vector<8x8xf32>
    %5 = tpu.matmul %3, %4, %cst {dimension_numbers = #tpu.dot_dimension_numbers<[1], [1], [0], [0], [0, 0, 1, 0], [], []>} : vector<8x32xf32>, vector<8x32xf32>, vector<8x8xf32> -> vector<8x8xf32>
    %c0_4 = arith.constant 0 : index
    %c0_5 = arith.constant 0 : index
    %6 = vector.load %arg7[%c0_4, %c0_5] : memref<8x8xf32, #tpu.memory_space<vmem>>, vector<8x8xf32>
    %7 = arith.maximumf %6, %5 : vector<8x8xf32>
    %c0_6 = arith.constant 0 : index
    %c0_7 = arith.constant 0 : index
    %8 = vector.load %arg8[%c0_6, %c0_7] : memref<8x8xf32, #tpu.memory_space<vmem>>, vector<8x8xf32>
    %9 = arith.subf %6, %7 : vector<8x8xf32>
    %10 = math.exp %9 : vector<8x8xf32>
    %11 = arith.mulf %8, %10 : vector<8x8xf32>
    %12 = arith.subf %5, %7 : vector<8x8xf32>
    %13 = math.exp %12 : vector<8x8xf32>
    %14 = arith.addf %11, %13 : vector<8x8xf32>
    %c0_8 = arith.constant 0 : index
    %c0_9 = arith.constant 0 : index
    %15 = vector.load %arg8[%c0_8, %c0_9] : memref<8x8xf32, #tpu.memory_space<vmem>>, vector<8x8xf32>
    tpu.vector_store %arg8[%c0_8, %c0_9], %14 {strides = array<i32>} : memref<8x8xf32, #tpu.memory_space<vmem>>, vector<8x8xf32>,
    %c0_10 = arith.constant 0 : index
    %c0_11 = arith.constant 0 : index
    %16 = vector.load %arg7[%c0_10, %c0_11] : memref<8x8xf32, #tpu.memory_space<vmem>>, vector<8x8xf32>
    tpu.vector_store %arg7[%c0_10, %c0_11], %7 {strides = array<i32>} : memref<8x8xf32, #tpu.memory_space<vmem>>, vector<8x8xf32>,
    %c0_i32_12 = arith.constant 0 : i32
    %17 = arith.cmpi eq, %arg1, %c0_i32_12 : i32
    %18 = arith.extui %17 : i1 to i32
    %c0_i32_13 = arith.constant 0 : i32
    %19 = arith.cmpi ne, %18, %c0_i32_13 : i32
    scf.if %19 {
      %c0_14 = arith.constant 0 : index
      %c0_15 = arith.constant 0 : index
      %20 = vector.load %arg7[%c0_14, %c0_15] : memref<8x8xf32, #tpu.memory_space<vmem>>, vector<8x8xf32>
      %cst_16 = arith.constant dense<0xFF800000> : vector<8xf32>
      %21 = vector.multi_reduction <maximumf>, %20, %cst_16 [1] : vector<8x8xf32> to vector<8xf32>
      %22 = vector.shape_cast %21 : vector<8xf32> to vector<8x1xf32>
      %c0_17 = arith.constant 0 : index
      %c0_18 = arith.constant 0 : index
      %23 = vector.load %arg8[%c0_17, %c0_18] : memref<8x8xf32, #tpu.memory_space<vmem>>, vector<8x8xf32>
      %24 = vector.broadcast %22 : vector<8x1xf32> to vector<8x8xf32>
      %25 = arith.subf %20, %24 : vector<8x8xf32>
      %26 = math.exp %25 : vector<8x8xf32>
      %27 = arith.mulf %23, %26 : vector<8x8xf32>
      %cst_19 = arith.constant dense<0.000000e+00> : vector<8xf32>
      %28 = vector.multi_reduction <add>, %27, %cst_19 [1] : vector<8x8xf32> to vector<8xf32>
      %29 = vector.shape_cast %28 : vector<8xf32> to vector<8x1xf32>
      %cst_20 = arith.constant -142.857147 : f32
      %30 = vector.broadcast %cst_20 : f32 to vector<8x1xf32>
      %31 = arith.subf %30, %22 : vector<8x1xf32>
      %32 = math.exp %31 : vector<8x1xf32>
      %33 = arith.addf %29, %32 : vector<8x1xf32>
      %34 = math.log %33 : vector<8x1xf32>
      %35 = arith.addf %22, %34 : vector<8x1xf32>
      %c0_21 = arith.constant 0 : index
      %c0_22 = arith.constant 0 : index
      %36 = vector.load %arg9[%c0_21, %c0_22] : memref<8x1xf32, #tpu.memory_space<vmem>>, vector<8x1xf32>
      %37 = arith.subf %35, %36 : vector<8x1xf32>
      %c0_23 = arith.constant 0 : index
      %c0_24 = arith.constant 0 : index
      %38 = vector.load %arg5[%c0_23, %c0_24] : memref<8x1xf32, #tpu.memory_space<vmem>>, vector<8x1xf32>
      tpu.vector_store %arg5[%c0_23, %c0_24], %37 {strides = array<i32>} : memref<8x1xf32, #tpu.memory_space<vmem>>, vector<8x1xf32>,
    } else {
    }
    return
  }
  func.func @transform_0(%arg0: i32, %arg1: i32) -> (i32, i32) {
    %c0_i32 = arith.constant 0 : i32
    %c0_i32_0 = arith.constant 0 : i32
    return %arg0, %c0_i32 : i32, i32
  }
  func.func @transform_1(%arg0: i32, %arg1: i32) -> (i32, i32) {
    %c0_i32 = arith.constant 0 : i32
    %c0_i32_0 = arith.constant 0 : i32
    return %arg0, %c0_i32 : i32, i32
  }
  func.func @transform_2(%arg0: i32, %arg1: i32) -> (i32, i32) {
    %c0_i32 = arith.constant 0 : i32
    %c0_i32_0 = arith.constant 0 : i32
    return %arg1, %c0_i32 : i32, i32
  }
  func.func @transform_3(%arg0: i32, %arg1: i32) -> (i32, i32) {
    %c0_i32 = arith.constant 0 : i32
    %c0_i32_0 = arith.constant 0 : i32
    return %arg0, %c0_i32 : i32, i32
  }
}

</mosaic_0001>

<bundles_post_ra>
// kernel: tpu_custom_call.1
= control target key start
LH: loop header
LB: loop body
LE: loop exit
PB: predicated region body
PF: predicated region fallthrough
CT: control target
= control target key end

     0   :  { %8 = vsyncpa [#allocation7], 0  ;;  %s363_s0 = inlined_call_operand.hbm [shape: f32[8,32], index: 0, kind: input, shape index: {}]   ;;  %s364_s1 = inlined_call_operand.hbm [shape: f32[8,32], index: 1, kind: input, shape index: {}]   ;;  %s365_s2 = inlined_call_operand.hbm [shape: f32[8,32], index: 2, kind: input, shape index: {}]   ;;  %s366_s3 = inlined_call_operand.vmem [shape: f32[8,1], index: 3, kind: output, shape index: {}]  }
   0x1   :  { %9 = vsyncpa [#allocation9], 0  ;;  %s288_s12 = smov [#allocation8]   ;;  %s289_s14 = smov [#allocation6]  }
   0x2   :  { %s26_s13 = sshll.u32 %s288_s12, 4  ;;  %s16_s15 = sshll.u32 %s289_s14, 4  ;;  %s27_s13 = int_to_ptr.vmem [resolvable:$true] %s26_s13  ;;  %s17_s15 = int_to_ptr.vmem [resolvable:$true] %s16_s15 }
   0x3   :  { %s218_s18 = scalar_lea.hbm %s364_s1, 128 }
   0x4   :  { %p219_p0 = scmp.ne.s32.totalorder %s364_s1, %s218_s18  ;;  %p222_p1 = scmp.lt.u32.totalorder %s218_s18, %s364_s1 }
   0x6   :  { %p224_p2 = pnand %p222_p1, %p219_p0 }
   0x8   :  { %227 = shalt.err (!%p224_p2)
}
   0x9   :  { %s228_s23 = scalar_lea.vmem %s27_s13, 128  ;;  %p233_p4 = scmp.lt.s32.totalorder %s27_s13, %s27_s13 }
   0xa   :  { %p229_p3 = scmp.ne.s32.totalorder %s27_s13, %s228_s23  ;;  %p234_p5 = scmp.lt.s32.totalorder %s228_s23, %s228_s23 }
   0xc   :  { %p235_p6 = por %p234_p5, %p233_p4 }
   0xe   :  { %p236_p7 = pnand %p235_p6, %p229_p3 }
  0x10   :  { %239 = shalt.err (!%p236_p7)
}
  0x11   :  { %29 = dma.hbm_to_vmem [thread:$0]  %s364_s1, 128, %s27_s13, [#allocation9]  }
  0x12   :  { %s240_s28 = scalar_lea.hbm %s363_s0, 128 }
  0x13   :  { %p241_p8 = scmp.ne.s32.totalorder %s363_s0, %s240_s28  ;;  %p244_p9 = scmp.lt.u32.totalorder %s240_s28, %s363_s0 }
  0x15   :  { %p246_p10 = pnand %p244_p9, %p241_p8 }
  0x17   :  { %249 = shalt.err (!%p246_p10)
}
  0x18   :  { %s250_s6 = scalar_lea.vmem %s17_s15, 128  ;;  %p255_p12 = scmp.lt.s32.totalorder %s17_s15, %s17_s15 }
  0x19   :  { %p251_p11 = scmp.ne.s32.totalorder %s17_s15, %s250_s6  ;;  %p256_p13 = scmp.lt.s32.totalorder %s250_s6, %s250_s6 }
  0x1b   :  { %p257_p0 = por %p256_p13, %p255_p12 }
  0x1d   :  { %p258_p1 = pnand %p257_p0, %p251_p11 }
  0x1f   :  { %261 = shalt.err (!%p258_p1)
}
  0x20   :  { %19 = dma.hbm_to_vmem [thread:$0]  %s363_s0, 128, %s17_s15, [#allocation7]  }
  0x21   :  { %s290_s8 = smov [#allocation10]   ;;  %s262_s12 = scalar_lea.hbm %s365_s2, 128 }
  0x22   :  { %s36_s9 = sshll.u32 %s290_s8, 4  ;;  %p263_p2 = scmp.ne.s32.totalorder %s365_s2, %s262_s12  ;;  %s37_s9 = int_to_ptr.vmem [resolvable:$true] %s36_s9 }
  0x23   :  { %p266_p3 = scmp.lt.u32.totalorder %s262_s12, %s365_s2 }
  0x25   :  { %p268_p4 = pnand %p266_p3, %p263_p2 }
  0x27   :  { %271 = shalt.err (!%p268_p4)
}
  0x28   :  { %s272_s18 = scalar_lea.vmem %s37_s9, 128  ;;  %p277_p6 = scmp.lt.s32.totalorder %s37_s9, %s37_s9 }
  0x29   :  { %p273_p5 = scmp.ne.s32.totalorder %s37_s9, %s272_s18  ;;  %p278_p7 = scmp.lt.s32.totalorder %s272_s18, %s272_s18 }
  0x2b   :  { %p279_p8 = por %p278_p7, %p277_p6 }
  0x2d   :  { %p280_p9 = pnand %p279_p8, %p273_p5 }
  0x2f   :  { %283 = shalt.err (!%p280_p9)
}
  0x30   :  { %39 = dma.hbm_to_vmem [thread:$0]  %s365_s2, 128, %s37_s9, [#allocation9]  }
  0x31   :  { %284 = dma.done.wait [#allocation7], 128  }
  0x32   :  { %285 = vsyncadd [#allocation7], 4294967168 }
  0x33   :  { %286 = dma.done.wait [#allocation9], 256  }
  0x34   :  { %287 = vsyncadd [#allocation9], 4294967040  ;;  %vm65_vm0 = vcmask 64512   ;;  %v291_v0 = vmov 0.0   ;;  %vm292_vm1 = vmmov 0   ;;  %v53_v2 = vld [vmem:[#allocation6] sm:$0xff] }
  0x35   :  { %67 = vst.msk [vmem:[#allocation4] sm:$0xff] %vm65_vm0, %v291_v0  ;;  %197 = vmatprep.subr.mxu0 %v291_v0  ;;  %199 = vmatprep.mubr.msk.f32.mxu0 %vm292_vm1, %v291_v0  ;;  %v293_v1 = vmov -1e+30   ;;  %vm56_vm2 = vcmask 261120   ;;  %v69_v3 = vld [vmem:[#allocation10] sm:$0xff]  ;;  %v54_v21 = vld [vmem:[#allocation8] sm:$0xff] }
  0x36   :  { %66 = vst.msk [vmem:[#allocation3] sm:$0xff] %vm65_vm0, %v293_v1  ;;  %v63_v4 = vmul.f32 14.285714, %v53_v2  ;;  %198 = vmatpush3.xpose.msk.msra.mxu0 %vm56_vm2, %v69_v3  ;;  %v55_v22 = vmul.f32 %v54_v21, %v53_v2  ;;  %vm61_vm3 = vcmask 7168  }
  0x38   :  { %64 = vst.msk [vmem:[#allocation2] sm:$0xff] %vm56_vm2, %v63_v4  ;;  %v57_v23 = vsel %vm56_vm2, %v55_v22, 0.0 }
  0x39   :  { %58 = vadd.xlane.f32.xlu1 %v57_v23 }
  0x3c   :  { %v149_v16 = vld [vmem:[#allocation4] sm:$0xff] }
  0x3d   :  { %v147_v6 = vld [vmem:[#allocation3] sm:$0xff] }
  0x3f   :  { %v68_v5 = vld [vmem:[#allocation2] sm:$0xff] }
  0x40   :  { %200 = vmatmul.mubr.msk.f32.vlgmr.msra.gmra.mrb[0].mxu0 %vm56_vm2, %v68_v5 }
  0xc6   :  { %v59_v31 = vpop.xlane.xlu1 %58 }
  0xc7   :  { %v60_v32 = vmul.f32 14.285714, %v59_v31 }
  0xc9   :  { %62 = vst.msk [vmem:[#allocation5] sm:$0xff] %vm61_vm3, %v60_v32 }
  0xd0   :  { %v183_v40 = vld [vmem:[#allocation5] sm:$0xff] }
 0x113   :  { %v143_v7 = vpop.f32.mrb[0].mxu0 }
 0x114   :  { %v148_v8 = vmax.f32 %v147_v6, %v143_v7  ;;  %v201_v9 = vpop.f32.mrb[1].mxu0 }
 0x116   :  { %v150_v10 = vsub.f32 %v147_v6, %v148_v8  ;;  %v154_v11 = vsub.f32 %v143_v7, %v148_v8  ;;  %160 = vst.msk [vmem:[#allocation3] sm:$0xff] %vm65_vm0, %v148_v8 }
 0x118   :  { %v151_v12 = vmul.f32 1.442695, %v150_v10  ;;  %v155_v13 = vmul.f32 1.442695, %v154_v11 }
 0x11a   :  { %208 = vpow2.f32 %v151_v12 }
 0x11b   :  { %210 = vpow2.f32 %v155_v13 }
 0x11d   :  { %v164_v14 = vld [vmem:[#allocation3] sm:$0xff] }
 0x11e   :  { %v165_v15 = vsel %vm65_vm0, %v164_v14, -inf }
 0x11f   :  { %166 = vmax.xlane.f32.xlu0 %v165_v15 }
 0x124   :  { %v209_v17 = vpop.eup %208 }
 0x125   :  { %v153_v18 = vmul.f32 %v209_v17, %v149_v16  ;;  %v211_v19 = vpop.eup %210 }
 0x127   :  { %v157_v20 = vadd.f32 %v211_v19, %v153_v18 }
 0x129   :  { %159 = vst.msk [vmem:[#allocation4] sm:$0xff] %vm65_vm0, %v157_v20 }
 0x130   :  { %v168_v28 = vld [vmem:[#allocation4] sm:$0xff] }
 0x1ac   :  { %v167_v24 = vpop.xlane.xlu0 %166 }
 0x1ad   :  { %v169_v25 = vsub.f32 %v164_v14, %v167_v24  ;;  %v176_v33 = vsub.f32 -142.85715, %v167_v24 }
 0x1af   :  { %v170_v26 = vmul.f32 1.442695, %v169_v25  ;;  %v177_v34 = vmul.f32 1.442695, %v176_v33 }
 0x1b1   :  { %212 = vpow2.f32 %v170_v26 }
 0x1b2   :  { %214 = vpow2.f32 %v177_v34 }
 0x1bb   :  { %v213_v27 = vpop.eup %212 }
 0x1bc   :  { %v172_v29 = vmul.f32 %v213_v27, %v168_v28  ;;  %v215_v35 = vpop.eup %214 }
 0x1be   :  { %v173_v30 = vsel %vm65_vm0, %v172_v29, 0.0 }
 0x1bf   :  { %174 = vadd.xlane.f32.xlu0 %v173_v30 }
 0x24c   :  { %v175_v36 = vpop.xlane.xlu0 %174 }
 0x24d   :  { %v179_v37 = vadd.f32 %v215_v35, %v175_v36 }
 0x24f   :  { %216 = vlog2.f32 %v179_v37 }
 0x259   :  { %v217_v38 = vpop.eup %216 }
 0x25a   :  { %v181_v39 = vmul.f32 0.6931472, %v217_v38 }
 0x25c   :  { %v182_v41 = vadd.f32 %v181_v39, %v167_v24 }
 0x25e   :  { %v184_v42 = vsub.f32 %v182_v41, %v183_v40 }
 0x260   :  { %186 = vst.msk [vmem:[%s366_s3] sm:$0xff] %vm61_vm3, %v184_v42 }
 0x261   :  { %191 = vsyncpa [#allocation7], 1 }
 0x262   :  { %192 = vsyncpa [#allocation9], 1 }

</bundles_post_ra>
